<compile_context>
chip_gen: v7x
topology: tpu7x:2x2x1
jax: 0.10.0
libtpu: 0.0.40
codegen_flags: <defaults>
</compile_context>

<pallas_src>
import functools

import jax
import jax.numpy as jnp
from jax.experimental import pallas as pl
from jax.experimental.pallas import tpu as pltpu

LN_EPS = 1e-5
LANE = 128
SUBLANE = 8


def _round_up(x, m):
    return (x + m - 1) // m * m


def _decoder_kernel(z_ref,
                    w1_ref, b1_ref, g1_ref, be1_ref,
                    w2_ref, b2_ref, g2_ref, be2_ref,
                    w3_ref, b3_ref,
                    o_ref,
                    *, inv_hidden, compute_dtype):
    """Fused MLP over one row tile.

    Feature dims are zero-padded to lane multiples in the wrapper. Pre-LN
    activations are exactly zero in padded lanes, so moments computed as
    (lane sum) * (1 / true_hidden) are exact. gamma/beta are zero-padded, so
    LN output (and everything downstream) stays zero in padded lanes.
    """

    def _ln_relu(h, gamma, beta):
        mu = jnp.sum(h, axis=-1, keepdims=True) * inv_hidden
        msq = jnp.sum(h * h, axis=-1, keepdims=True) * inv_hidden
        var = msq - mu * mu                      # biased variance (matches torch LN)
        y = (h - mu) * jax.lax.rsqrt(var + LN_EPS) * gamma + beta
        return jnp.maximum(y, 0.0)

    x = z_ref[...]                               # (tile, d_lat_p) compute_dtype

    # Linear 1 + LayerNorm + ReLU (+ Dropout as identity, eval mode)
    h = jnp.dot(x, w1_ref[...], preferred_element_type=jnp.float32) + b1_ref[...]
    h = _ln_relu(h, g1_ref[...], be1_ref[...]).astype(compute_dtype)

    # Linear 2 + LayerNorm + ReLU (+ Dropout as identity, eval mode)
    h = jnp.dot(h, w2_ref[...], preferred_element_type=jnp.float32) + b2_ref[...]
    h = _ln_relu(h, g2_ref[...], be2_ref[...]).astype(compute_dtype)

    # Linear 3 (output projection); padded output lanes are zero -> lane-dense vst.
    out = jnp.dot(h, w3_ref[...], preferred_element_type=jnp.float32) + b3_ref[...]
    o_ref[...] = out.astype(o_ref.dtype)


@functools.partial(jax.jit, static_argnames=("tile_rows", "compute_dtype"))
def decoder_forward(z, params, tile_rows=256, compute_dtype=jnp.bfloat16):
    """z: (B, d_lat). params: dict of f32 weights (see init_params).

    tile_rows: row tile (256 good on v6e/v7x, 128 on v5e).
    compute_dtype: matmul operand dtype (bf16 default; accumulation is f32).
    """
    B, d_lat = z.shape
    hidden = params["w1"].shape[1]
    d_out = params["w3"].shape[1]

    cdt = jnp.dtype(compute_dtype)
    out_dtype = z.dtype

    # Lane-pad feature dims to multiples of 128; row-pad batch to the row tile.
    d_lat_p = _round_up(d_lat, LANE)
    hidden_p = _round_up(hidden, LANE)
    d_out_p = _round_up(d_out, LANE)

    tile_rows = _round_up(max(int(tile_rows), SUBLANE), SUBLANE)
    tile = min(tile_rows, _round_up(B, SUBLANE))
    B_p = _round_up(B, tile)

    def pad2(a, rows, cols, dtype):
        return jnp.pad(a.astype(dtype),
                       ((0, rows - a.shape[0]), (0, cols - a.shape[1])))

    z_p = pad2(z, B_p, d_lat_p, cdt)
    w1 = pad2(params["w1"], d_lat_p, hidden_p, cdt)
    w2 = pad2(params["w2"], hidden_p, hidden_p, cdt)
    w3 = pad2(params["w3"], hidden_p, d_out_p, cdt)
    b1 = pad2(params["b1"], 1, hidden_p, jnp.float32)
    g1 = pad2(params["g1"], 1, hidden_p, jnp.float32)
    be1 = pad2(params["be1"], 1, hidden_p, jnp.float32)
    b2 = pad2(params["b2"], 1, hidden_p, jnp.float32)
    g2 = pad2(params["g2"], 1, hidden_p, jnp.float32)
    be2 = pad2(params["be2"], 1, hidden_p, jnp.float32)
    b3 = pad2(params["b3"], 1, d_out_p, jnp.float32)

    # Explicit scoped-VMEM budget: resident weights + (double-buffered) row tiles
    # + f32 intermediates, with headroom; capped at v7x's 64 MiB per TensorCore.
    w_bytes = (d_lat_p * hidden_p + hidden_p * hidden_p
               + hidden_p * d_out_p) * cdt.itemsize
    vec_bytes = (6 * hidden_p + d_out_p) * 4
    io_bytes = tile * (d_lat_p * cdt.itemsize
                       + d_out_p * jnp.dtype(out_dtype).itemsize)
    scratch_bytes = 4 * tile * hidden_p * 4
    vmem_limit = 2 * (w_bytes + vec_bytes + io_bytes) + scratch_bytes + (8 << 20)
    vmem_limit = int(max(32 << 20, min(vmem_limit, 64 << 20)))

    kernel = functools.partial(_decoder_kernel,
                               inv_hidden=1.0 / float(hidden),
                               compute_dtype=cdt)

    def row_spec(cols):
        return pl.BlockSpec((tile, cols), lambda i: (i, 0))

    def full_spec(shape):
        return pl.BlockSpec(shape, lambda i: (0,) * len(shape))

    out_p = pl.pallas_call(
        kernel,
        out_shape=jax.ShapeDtypeStruct((B_p, d_out_p), out_dtype),
        grid_spec=pltpu.PrefetchScalarGridSpec(
            num_scalar_prefetch=0,
            grid=(B_p // tile,),
            in_specs=[
                row_spec(d_lat_p),                 # z tile
                full_spec((d_lat_p, hidden_p)),    # w1
                full_spec((1, hidden_p)),          # b1
                full_spec((1, hidden_p)),          # gamma1
                full_spec((1, hidden_p)),          # beta1
                full_spec((hidden_p, hidden_p)),   # w2
                full_spec((1, hidden_p)),          # b2
                full_spec((1, hidden_p)),          # gamma2
                full_spec((1, hidden_p)),          # beta2
                full_spec((hidden_p, d_out_p)),    # w3
                full_spec((1, d_out_p)),           # b3
            ],
            out_specs=row_spec(d_out_p),
        ),
        compiler_params=pltpu.CompilerParams(
            dimension_semantics=("parallel",),
            vmem_limit_bytes=vmem_limit),
    )(z_p, w1, b1, g1, be1, w2, b2, g2, be2, w3, b3)

    return out_p[:B, :d_out]


def init_params(key, d_lat, hidden, d_out):
    """Deterministic synthetic parameters (f32).

    Linear weights are stored pre-transposed as (in_features, out_features)
    so the kernel computes x @ W + b (equivalent to PyTorch's x @ W.T + b).
    """
    ks = jax.random.split(key, 6)
    s1 = 1.0 / jnp.sqrt(d_lat)
    s2 = 1.0 / jnp.sqrt(hidden)
    return {
        "w1": jax.random.uniform(ks[0], (d_lat, hidden), jnp.float32, -s1, s1),
        "b1": jax.random.uniform(ks[1], (1, hidden), jnp.float32, -s1, s1),
        "g1": jnp.ones((1, hidden), jnp.float32),
        "be1": jnp.zeros((1, hidden), jnp.float32),
        "w2": jax.random.uniform(ks[2], (hidden, hidden), jnp.float32, -s2, s2),
        "b2": jax.random.uniform(ks[3], (1, hidden), jnp.float32, -s2, s2),
        "g2": jnp.ones((1, hidden), jnp.float32),
        "be2": jnp.zeros((1, hidden), jnp.float32),
        "w3": jax.random.uniform(ks[4], (hidden, d_out), jnp.float32, -s2, s2),
        "b3": jax.random.uniform(ks[5], (1, d_out), jnp.float32, -s2, s2),
    }


def decoder_reference(z, p, compute_dtype=jnp.float32):
    """Pure-JAX reference (eval-mode dropout = identity).

    compute_dtype casts matmul operands (f32 accumulation), mirroring the kernel.
    """
    cdt = jnp.dtype(compute_dtype)

    def ln(h, g, b):
        mu = jnp.mean(h, axis=-1, keepdims=True)
        var = jnp.mean((h - mu) ** 2, axis=-1, keepdims=True)
        return (h - mu) / jnp.sqrt(var + LN_EPS) * g + b

    def mm(x, w):
        return jnp.dot(x.astype(cdt), w.astype(cdt),
                       preferred_element_type=jnp.float32)

    h = jnp.maximum(ln(mm(z, p["w1"]) + p["b1"], p["g1"], p["be1"]), 0.0)
    h = jnp.maximum(ln(mm(h, p["w2"]) + p["b2"], p["g2"], p["be2"]), 0.0)
    return mm(h, p["w3"]) + p["b3"]


if __name__ == "__main__":
    key = jax.random.PRNGKey(0)
    k_param, k_z = jax.random.split(key)

    B, d_lat, hidden, d_out = 16, 8, 32, 12
    params = init_params(k_param, d_lat, hidden, d_out)
    z = jax.random.normal(k_z, (B, d_lat), jnp.float32)

    # Default (bf16 matmul operands) path.
    out = jax.block_until_ready(decoder_forward(z, params))
    assert out.shape == (B, d_out)
    ref_bf16 = decoder_reference(z, params, compute_dtype=jnp.bfloat16)
    assert jnp.allclose(out, ref_bf16, atol=2e-2, rtol=2e-2), "bf16 mismatch"

    # Full-precision path: exact semantic check vs the f32 reference.
    out_f32 = jax.block_until_ready(
        decoder_forward(z, params, compute_dtype=jnp.float32))
    ref_f32 = decoder_reference(z, params)
    assert jnp.allclose(out_f32, ref_f32, atol=1e-4, rtol=1e-4), "f32 mismatch"

    print("KERNEL_OK")
</pallas_src>

<mosaic_0001>
module attributes {stable_mosaic.version = 11 : i64} {
  func.func @_decoder_kernel(%arg0: i32, %arg1: memref<16x128xbf16, #tpu.memory_space<vmem>>, %arg2: memref<128x128xbf16, #tpu.memory_space<vmem>>, %arg3: memref<1x128xf32, #tpu.memory_space<vmem>>, %arg4: memref<1x128xf32, #tpu.memory_space<vmem>>, %arg5: memref<1x128xf32, #tpu.memory_space<vmem>>, %arg6: memref<128x128xbf16, #tpu.memory_space<vmem>>, %arg7: memref<1x128xf32, #tpu.memory_space<vmem>>, %arg8: memref<1x128xf32, #tpu.memory_space<vmem>>, %arg9: memref<1x128xf32, #tpu.memory_space<vmem>>, %arg10: memref<128x128xbf16, #tpu.memory_space<vmem>>, %arg11: memref<1x128xf32, #tpu.memory_space<vmem>>, %arg12: memref<16x128xf32, #tpu.memory_space<vmem>>) attributes {dimension_semantics = [#tpu.dimension_semantics<parallel>], iteration_bounds = array<i64: 1>, scalar_prefetch = 0 : i64, scratch_operands = 0 : i64, tpu.core_type = #tpu.core_type<tc>, window_params = [{transform_indices = @transform_0, window_bounds = array<i64: 16, 128>}, {pipeline_mode = #tpu.pipeline_mode<synchronous>, transform_indices = @transform_1, window_bounds = array<i64: 128, 128>}, {pipeline_mode = #tpu.pipeline_mode<synchronous>, transform_indices = @transform_2, window_bounds = array<i64: 1, 128>}, {pipeline_mode = #tpu.pipeline_mode<synchronous>, transform_indices = @transform_3, window_bounds = array<i64: 1, 128>}, {pipeline_mode = #tpu.pipeline_mode<synchronous>, transform_indices = @transform_4, window_bounds = array<i64: 1, 128>}, {pipeline_mode = #tpu.pipeline_mode<synchronous>, transform_indices = @transform_5, window_bounds = array<i64: 128, 128>}, {pipeline_mode = #tpu.pipeline_mode<synchronous>, transform_indices = @transform_6, window_bounds = array<i64: 1, 128>}, {pipeline_mode = #tpu.pipeline_mode<synchronous>, transform_indices = @transform_7, window_bounds = array<i64: 1, 128>}, {pipeline_mode = #tpu.pipeline_mode<synchronous>, transform_indices = @transform_8, window_bounds = array<i64: 1, 128>}, {pipeline_mode = #tpu.pipeline_mode<synchronous>, transform_indices = @transform_9, window_bounds = array<i64: 128, 128>}, {pipeline_mode = #tpu.pipeline_mode<synchronous>, transform_indices = @transform_10, window_bounds = array<i64: 1, 128>}, {transform_indices = @transform_11, window_bounds = array<i64: 16, 128>}]} {
    %c0 = arith.constant 0 : index
    %c0_0 = arith.constant 0 : index
    %0 = vector.load %arg1[%c0, %c0_0] : memref<16x128xbf16, #tpu.memory_space<vmem>>, vector<16x128xbf16>
    %c0_1 = arith.constant 0 : index
    %c0_2 = arith.constant 0 : index
    %1 = vector.load %arg2[%c0_1, %c0_2] : memref<128x128xbf16, #tpu.memory_space<vmem>>, vector<128x128xbf16>
    %cst = arith.constant dense<0.000000e+00> : vector<16x128xf32>
    %2 = tpu.matmul %0, %1, %cst {dimension_numbers = #tpu.dot_dimension_numbers<[1], [0], [0], [1], [0, 0, 1, 1], [], []>} : vector<16x128xbf16>, vector<128x128xbf16>, vector<16x128xf32> -> vector<16x128xf32>
    %c0_3 = arith.constant 0 : index
    %c0_4 = arith.constant 0 : index
    %3 = vector.load %arg3[%c0_3, %c0_4] : memref<1x128xf32, #tpu.memory_space<vmem>>, vector<1x128xf32>
    %4 = vector.broadcast %3 : vector<1x128xf32> to vector<16x128xf32>
    %5 = arith.addf %2, %4 : vector<16x128xf32>
    %c0_5 = arith.constant 0 : index
    %c0_6 = arith.constant 0 : index
    %6 = vector.load %arg4[%c0_5, %c0_6] : memref<1x128xf32, #tpu.memory_space<vmem>>, vector<1x128xf32>
    %c0_7 = arith.constant 0 : index
    %c0_8 = arith.constant 0 : index
    %7 = vector.load %arg5[%c0_7, %c0_8] : memref<1x128xf32, #tpu.memory_space<vmem>>, vector<1x128xf32>
    %cst_9 = arith.constant dense<0.000000e+00> : vector<16xf32>
    %8 = vector.multi_reduction <add>, %5, %cst_9 [1] : vector<16x128xf32> to vector<16xf32>
    %9 = vector.shape_cast %8 : vector<16xf32> to vector<16x1xf32>
    %cst_10 = arith.constant 3.125000e-02 : f32
    %10 = vector.broadcast %cst_10 : f32 to vector<16x1xf32>
    %11 = arith.mulf %9, %10 : vector<16x1xf32>
    %12 = arith.mulf %5, %5 : vector<16x128xf32>
    %cst_11 = arith.constant dense<0.000000e+00> : vector<16xf32>
    %13 = vector.multi_reduction <add>, %12, %cst_11 [1] : vector<16x128xf32> to vector<16xf32>
    %14 = vector.shape_cast %13 : vector<16xf32> to vector<16x1xf32>
    %cst_12 = arith.constant 3.125000e-02 : f32
    %15 = vector.broadcast %cst_12 : f32 to vector<16x1xf32>
    %16 = arith.mulf %14, %15 : vector<16x1xf32>
    %17 = arith.mulf %11, %11 : vector<16x1xf32>
    %18 = arith.subf %16, %17 : vector<16x1xf32>
    %19 = vector.broadcast %11 : vector<16x1xf32> to vector<16x128xf32>
    %20 = arith.subf %5, %19 : vector<16x128xf32>
    %cst_13 = arith.constant 9.99999974E-6 : f32
    %21 = vector.broadcast %cst_13 : f32 to vector<16x1xf32>
    %22 = arith.addf %18, %21 : vector<16x1xf32>
    %23 = math.rsqrt %22 : vector<16x1xf32>
    %24 = vector.broadcast %23 : vector<16x1xf32> to vector<16x128xf32>
    %25 = arith.mulf %20, %24 : vector<16x128xf32>
    %26 = vector.broadcast %6 : vector<1x128xf32> to vector<16x128xf32>
    %27 = arith.mulf %25, %26 : vector<16x128xf32>
    %28 = vector.broadcast %7 : vector<1x128xf32> to vector<16x128xf32>
    %29 = arith.addf %27, %28 : vector<16x128xf32>
    %cst_14 = arith.constant 0.000000e+00 : f32
    %30 = vector.broadcast %cst_14 : f32 to vector<16x128xf32>
    %31 = arith.maximumf %29, %30 : vector<16x128xf32>
    %32 = arith.truncf %31 : vector<16x128xf32> to vector<16x128xbf16>
    %c0_15 = arith.constant 0 : index
    %c0_16 = arith.constant 0 : index
    %33 = vector.load %arg6[%c0_15, %c0_16] : memref<128x128xbf16, #tpu.memory_space<vmem>>, vector<128x128xbf16>
    %cst_17 = arith.constant dense<0.000000e+00> : vector<16x128xf32>
    %34 = tpu.matmul %32, %33, %cst_17 {dimension_numbers = #tpu.dot_dimension_numbers<[1], [0], [0], [1], [0, 0, 1, 1], [], []>} : vector<16x128xbf16>, vector<128x128xbf16>, vector<16x128xf32> -> vector<16x128xf32>
    %c0_18 = arith.constant 0 : index
    %c0_19 = arith.constant 0 : index
    %35 = vector.load %arg7[%c0_18, %c0_19] : memref<1x128xf32, #tpu.memory_space<vmem>>, vector<1x128xf32>
    %36 = vector.broadcast %35 : vector<1x128xf32> to vector<16x128xf32>
    %37 = arith.addf %34, %36 : vector<16x128xf32>
    %c0_20 = arith.constant 0 : index
    %c0_21 = arith.constant 0 : index
    %38 = vector.load %arg8[%c0_20, %c0_21] : memref<1x128xf32, #tpu.memory_space<vmem>>, vector<1x128xf32>
    %c0_22 = arith.constant 0 : index
    %c0_23 = arith.constant 0 : index
    %39 = vector.load %arg9[%c0_22, %c0_23] : memref<1x128xf32, #tpu.memory_space<vmem>>, vector<1x128xf32>
    %cst_24 = arith.constant dense<0.000000e+00> : vector<16xf32>
    %40 = vector.multi_reduction <add>, %37, %cst_24 [1] : vector<16x128xf32> to vector<16xf32>
    %41 = vector.shape_cast %40 : vector<16xf32> to vector<16x1xf32>
    %cst_25 = arith.constant 3.125000e-02 : f32
    %42 = vector.broadcast %cst_25 : f32 to vector<16x1xf32>
    %43 = arith.mulf %41, %42 : vector<16x1xf32>
    %44 = arith.mulf %37, %37 : vector<16x128xf32>
    %cst_26 = arith.constant dense<0.000000e+00> : vector<16xf32>
    %45 = vector.multi_reduction <add>, %44, %cst_26 [1] : vector<16x128xf32> to vector<16xf32>
    %46 = vector.shape_cast %45 : vector<16xf32> to vector<16x1xf32>
    %cst_27 = arith.constant 3.125000e-02 : f32
    %47 = vector.broadcast %cst_27 : f32 to vector<16x1xf32>
    %48 = arith.mulf %46, %47 : vector<16x1xf32>
    %49 = arith.mulf %43, %43 : vector<16x1xf32>
    %50 = arith.subf %48, %49 : vector<16x1xf32>
    %51 = vector.broadcast %43 : vector<16x1xf32> to vector<16x128xf32>
    %52 = arith.subf %37, %51 : vector<16x128xf32>
    %cst_28 = arith.constant 9.99999974E-6 : f32
    %53 = vector.broadcast %cst_28 : f32 to vector<16x1xf32>
    %54 = arith.addf %50, %53 : vector<16x1xf32>
    %55 = math.rsqrt %54 : vector<16x1xf32>
    %56 = vector.broadcast %55 : vector<16x1xf32> to vector<16x128xf32>
    %57 = arith.mulf %52, %56 : vector<16x128xf32>
    %58 = vector.broadcast %38 : vector<1x128xf32> to vector<16x128xf32>
    %59 = arith.mulf %57, %58 : vector<16x128xf32>
    %60 = vector.broadcast %39 : vector<1x128xf32> to vector<16x128xf32>
    %61 = arith.addf %59, %60 : vector<16x128xf32>
    %cst_29 = arith.constant 0.000000e+00 : f32
    %62 = vector.broadcast %cst_29 : f32 to vector<16x128xf32>
    %63 = arith.maximumf %61, %62 : vector<16x128xf32>
    %64 = arith.truncf %63 : vector<16x128xf32> to vector<16x128xbf16>
    %c0_30 = arith.constant 0 : index
    %c0_31 = arith.constant 0 : index
    %65 = vector.load %arg10[%c0_30, %c0_31] : memref<128x128xbf16, #tpu.memory_space<vmem>>, vector<128x128xbf16>
    %cst_32 = arith.constant dense<0.000000e+00> : vector<16x128xf32>
    %66 = tpu.matmul %64, %65, %cst_32 {dimension_numbers = #tpu.dot_dimension_numbers<[1], [0], [0], [1], [0, 0, 1, 1], [], []>} : vector<16x128xbf16>, vector<128x128xbf16>, vector<16x128xf32> -> vector<16x128xf32>
    %c0_33 = arith.constant 0 : index
    %c0_34 = arith.constant 0 : index
    %67 = vector.load %arg11[%c0_33, %c0_34] : memref<1x128xf32, #tpu.memory_space<vmem>>, vector<1x128xf32>
    %68 = vector.broadcast %67 : vector<1x128xf32> to vector<16x128xf32>
    %69 = arith.addf %66, %68 : vector<16x128xf32>
    %c0_35 = arith.constant 0 : index
    %c0_36 = arith.constant 0 : index
    %70 = vector.load %arg12[%c0_35, %c0_36] : memref<16x128xf32, #tpu.memory_space<vmem>>, vector<16x128xf32>
    tpu.vector_store %arg12[%c0_35, %c0_36], %69 {strides = array<i32>} : memref<16x128xf32, #tpu.memory_space<vmem>>, vector<16x128xf32>,
    return
  }
  func.func @transform_0(%arg0: i32) -> (i32, i32) {
    %c0_i32 = arith.constant 0 : i32
    %c0_i32_0 = arith.constant 0 : i32
    return %arg0, %c0_i32 : i32, i32
  }
  func.func @transform_1(%arg0: i32) -> (i32, i32) {
    %c0_i32 = arith.constant 0 : i32
    %c0_i32_0 = arith.constant 0 : i32
    %c0_i32_1 = arith.constant 0 : i32
    return %c0_i32, %c0_i32_0 : i32, i32
  }
  func.func @transform_2(%arg0: i32) -> (i32, i32) {
    %c0_i32 = arith.constant 0 : i32
    %c0_i32_0 = arith.constant 0 : i32
    %c0_i32_1 = arith.constant 0 : i32
    return %c0_i32, %c0_i32_0 : i32, i32
  }
  func.func @transform_3(%arg0: i32) -> (i32, i32) {
    %c0_i32 = arith.constant 0 : i32
    %c0_i32_0 = arith.constant 0 : i32
    %c0_i32_1 = arith.constant 0 : i32
    return %c0_i32, %c0_i32_0 : i32, i32
  }
  func.func @transform_4(%arg0: i32) -> (i32, i32) {
    %c0_i32 = arith.constant 0 : i32
    %c0_i32_0 = arith.constant 0 : i32
    %c0_i32_1 = arith.constant 0 : i32
    return %c0_i32, %c0_i32_0 : i32, i32
  }
  func.func @transform_5(%arg0: i32) -> (i32, i32) {
    %c0_i32 = arith.constant 0 : i32
    %c0_i32_0 = arith.constant 0 : i32
    %c0_i32_1 = arith.constant 0 : i32
    return %c0_i32, %c0_i32_0 : i32, i32
  }
  func.func @transform_6(%arg0: i32) -> (i32, i32) {
    %c0_i32 = arith.constant 0 : i32
    %c0_i32_0 = arith.constant 0 : i32
    %c0_i32_1 = arith.constant 0 : i32
    return %c0_i32, %c0_i32_0 : i32, i32
  }
  func.func @transform_7(%arg0: i32) -> (i32, i32) {
    %c0_i32 = arith.constant 0 : i32
    %c0_i32_0 = arith.constant 0 : i32
    %c0_i32_1 = arith.constant 0 : i32
    return %c0_i32, %c0_i32_0 : i32, i32
  }
  func.func @transform_8(%arg0: i32) -> (i32, i32) {
    %c0_i32 = arith.constant 0 : i32
    %c0_i32_0 = arith.constant 0 : i32
    %c0_i32_1 = arith.constant 0 : i32
    return %c0_i32, %c0_i32_0 : i32, i32
  }
  func.func @transform_9(%arg0: i32) -> (i32, i32) {
    %c0_i32 = arith.constant 0 : i32
    %c0_i32_0 = arith.constant 0 : i32
    %c0_i32_1 = arith.constant 0 : i32
    return %c0_i32, %c0_i32_0 : i32, i32
  }
  func.func @transform_10(%arg0: i32) -> (i32, i32) {
    %c0_i32 = arith.constant 0 : i32
    %c0_i32_0 = arith.constant 0 : i32
    %c0_i32_1 = arith.constant 0 : i32
    return %c0_i32, %c0_i32_0 : i32, i32
  }
  func.func @transform_11(%arg0: i32) -> (i32, i32) {
    %c0_i32 = arith.constant 0 : i32
    %c0_i32_0 = arith.constant 0 : i32
    return %arg0, %c0_i32 : i32, i32
  }
}

</mosaic_0001>

<bundles_post_ra>
// kernel: decoder_forward.1
= control target key start
LH: loop header
LB: loop body
LE: loop exit
PB: predicated region body
PF: predicated region fallthrough
CT: control target
= control target key end

     0   :  { %v677_v1 = vmov 0.0   ;;  %vm678_vm0 = vmmov 0   ;;  %s880_s0 = inlined_call_operand.vmem [shape: bf16[16,128], index: 0, kind: input, shape index: {}]   ;;  %s881_s1 = inlined_call_operand.vmem [shape: bf16[128,128], index: 1, kind: input, shape index: {}]   ;;  %s882_s2 = inlined_call_operand.vmem [shape: f32[1,128], index: 2, kind: input, shape index: {}]   ;;  %s883_s3 = inlined_call_operand.vmem [shape: f32[1,128], index: 3, kind: input, shape index: {}]   ;;  %s884_s4 = inlined_call_operand.vmem [shape: f32[1,128], index: 4, kind: input, shape index: {}]   ;;  %s885_s5 = inlined_call_operand.vmem [shape: bf16[128,128], index: 5, kind: input, shape index: {}]   ;;  %s886_s6 = inlined_call_operand.vmem [shape: f32[1,128], index: 6, kind: input, shape index: {}]   ;;  %s887_s7 = inlined_call_operand.vmem [shape: f32[1,128], index: 7, kind: input, shape index: {}]   ;;  %s888_s8 = inlined_call_operand.vmem [shape: f32[1,128], index: 8, kind: input, shape index: {}]   ;;  %s889_s9 = inlined_call_operand.vmem [shape: bf16[128,128], index: 9, kind: input, shape index: {}]   ;;  %s890_s10 = inlined_call_operand.vmem [shape: f32[1,128], index: 10, kind: input, shape index: {}]   ;;  %s891_s11 = inlined_call_operand.hbm [shape: f32[16,128], index: 11, kind: output, shape index: {}]  }
   0x1   :  { %v620_v0 = vld [vmem:[%s881_s1] sm:$0xff]   ;;  %555 = vmatprep.subr.bf16.mxu0 %v677_v1  ;;  %575 = vmatprep.subr.bf16.mxu1 %v677_v1  ;;  %v621_v2 = vld [vmem:[%s881_s1 + $0x8] sm:$0xff]   ;;  %v622_v3 = vld [vmem:[%s881_s1 + $0x10] sm:$0xff]  }
   0x2   :  { %556 = vmatpush3.bf16.msra.mxu0 %v620_v0  ;;  %571 = vmatprep.mubr.msk.bf16.mxu0 %vm678_vm0, %v677_v1  ;;  %v623_v4 = vld [vmem:[%s881_s1 + $0x18] sm:$0xff]   ;;  %v624_v5 = vld [vmem:[%s881_s1 + $0x20] sm:$0xff]   ;;  %v625_v6 = vld [vmem:[%s881_s1 + $0x28] sm:$0xff]  }
   0x3   :  { %557 = vmatprep.subr.bf16.mxu0 %v677_v1  ;;  %591 = vmatprep.mubr.msk.bf16.mxu1 %vm678_vm0, %v677_v1 }
   0x6   :  { %558 = vmatpush3.bf16.msra.mxu0 %v621_v2 }
   0x7   :  { %559 = vmatprep.subr.bf16.mxu0 %v677_v1 }
   0xa   :  { %560 = vmatpush3.bf16.msra.mxu0 %v622_v3 }
   0xb   :  { %561 = vmatprep.subr.bf16.mxu0 %v677_v1 }
   0xe   :  { %562 = vmatpush3.bf16.msra.mxu0 %v623_v4 }
   0xf   :  { %563 = vmatprep.subr.bf16.mxu0 %v677_v1 }
  0x12   :  { %564 = vmatpush3.bf16.msra.mxu0 %v624_v5 }
  0x13   :  { %565 = vmatprep.subr.bf16.mxu0 %v677_v1 }
  0x14   :  { %16 = vsyncpa [#allocation3], 0  ;;  %v626_v7 = vld [vmem:[%s881_s1 + $0x30] sm:$0xff]   ;;  %v627_v8 = vld [vmem:[%s881_s1 + $0x38] sm:$0xff]  }
  0x15   :  { %v628_v9 = vld [vmem:[%s880_s0] sm:$0xff]   ;;  %v630_v20 = vld [vmem:[%s885_s5 + $0x8] sm:$0xff]   ;;  %v631_v21 = vld [vmem:[%s885_s5 + $0x10] sm:$0xff]  }
  0x16   :  { %566 = vmatpush3.bf16.msra.mxu0 %v625_v6  ;;  %v496_v10 = vld [vmem:[%s882_s2] ss:$0 sm:$0xff]  ;;  %v632_v22 = vld [vmem:[%s885_s5 + $0x18] sm:$0xff]   ;;  %v634_v24 = vld [vmem:[%s885_s5 + $0x28] sm:$0xff]  }
  0x17   :  { %567 = vmatprep.subr.bf16.mxu0 %v677_v1  ;;  %v629_v19 = vld [vmem:[%s885_s5] sm:$0xff]   ;;  %v635_v25 = vld [vmem:[%s885_s5 + $0x30] sm:$0xff]   ;;  %v636_v26 = vld [vmem:[%s885_s5 + $0x38] sm:$0xff]  }
  0x18   :  { %576 = vmatpush3.bf16.msra.mxu1 %v629_v19  ;;  %v633_v23 = vld [vmem:[%s885_s5 + $0x20] sm:$0xff]   ;;  %v638_v3 = vld [vmem:[%s889_s9 + $0x8] sm:$0xff]   ;;  %v639_v4 = vld [vmem:[%s889_s9 + $0x10] sm:$0xff]  }
  0x19   :  { %577 = vmatprep.subr.bf16.mxu1 %v677_v1  ;;  %v506_v43 = vld [vmem:[%s883_s3] ss:$0 sm:$0xff]  ;;  %v640_v5 = vld [vmem:[%s889_s9 + $0x18] sm:$0xff]  }
  0x1a   :  { %568 = vmatpush3.bf16.msra.mxu0 %v626_v7  ;;  %v507_v48 = vld [vmem:[%s884_s4] ss:$0 sm:$0xff]  ;;  %v642_v7 = vld [vmem:[%s889_s9 + $0x28] sm:$0xff]  }
  0x1b   :  { %569 = vmatprep.subr.bf16.mxu0 %v677_v1  ;;  %v508_v56 = vld [vmem:[%s886_s6] ss:$0 sm:$0xff] }
  0x1c   :  { %578 = vmatpush3.bf16.msra.mxu1 %v630_v20  ;;  %v637_v2 = vld [vmem:[%s889_s9] sm:$0xff]  }
  0x1d   :  { %579 = vmatprep.subr.bf16.mxu1 %v677_v1  ;;  %v641_v6 = vld [vmem:[%s889_s9 + $0x20] sm:$0xff]  }
  0x1e   :  { %570 = vmatpush3.bf16.msra.mxu0 %v627_v8  ;;  %v643_v8 = vld [vmem:[%s889_s9 + $0x30] sm:$0xff]  }
  0x1f   :  { %595 = vmatprep.subr.bf16.mxu0 %v677_v1 }
  0x20   :  { %580 = vmatpush3.bf16.msra.mxu1 %v631_v21 }
  0x21   :  { %572 = vmatmul.mubr.bf16.vlgmr.msra.gmra.mrb[0].mxu0 %v628_v9  ;;  %581 = vmatprep.subr.bf16.mxu1 %v677_v1  ;;  %v644_v9 = vld [vmem:[%s889_s9 + $0x38] sm:$0xff]  }
  0x22   :  { %611 = vmatprep.mubr.msk.bf16.mxu0 %vm678_vm0, %v677_v1  ;;  %596 = vmatpush3.bf16.msra.mxu0 %v637_v2 }
  0x23   :  { %597 = vmatprep.subr.bf16.mxu0 %v677_v1 }
  0x24   :  { %582 = vmatpush3.bf16.msra.mxu1 %v632_v22 }
  0x25   :  { %583 = vmatprep.subr.bf16.mxu1 %v677_v1 }
  0x26   :  { %598 = vmatpush3.bf16.msra.mxu0 %v638_v3 }
  0x27   :  { %599 = vmatprep.subr.bf16.mxu0 %v677_v1 }
  0x28   :  { %584 = vmatpush3.bf16.msra.mxu1 %v633_v23 }
  0x29   :  { %585 = vmatprep.subr.bf16.mxu1 %v677_v1 }
  0x2a   :  { %600 = vmatpush3.bf16.msra.mxu0 %v639_v4 }
  0x2b   :  { %601 = vmatprep.subr.bf16.mxu0 %v677_v1 }
  0x2c   :  { %586 = vmatpush3.bf16.msra.mxu1 %v634_v24 }
  0x2d   :  { %587 = vmatprep.subr.bf16.mxu1 %v677_v1 }
  0x2e   :  { %602 = vmatpush3.bf16.msra.mxu0 %v640_v5 }
  0x2f   :  { %603 = vmatprep.subr.bf16.mxu0 %v677_v1 }
  0x30   :  { %588 = vmatpush3.bf16.msra.mxu1 %v635_v25 }
  0x31   :  { %589 = vmatprep.subr.bf16.mxu1 %v677_v1 }
  0x32   :  { %604 = vmatpush3.bf16.msra.mxu0 %v641_v6 }
  0x33   :  { %605 = vmatprep.subr.bf16.mxu0 %v677_v1 }
  0x34   :  { %590 = vmatpush3.bf16.msra.mxu1 %v636_v26 }
  0x36   :  { %606 = vmatpush3.bf16.msra.mxu0 %v642_v7 }
  0x37   :  { %607 = vmatprep.subr.bf16.mxu0 %v677_v1 }
  0x3a   :  { %608 = vmatpush3.bf16.msra.mxu0 %v643_v8 }
  0x3b   :  { %609 = vmatprep.subr.bf16.mxu0 %v677_v1  ;;  %v517_v1 = vld [vmem:[%s887_s7] ss:$0 sm:$0xff]  ;;  %s679_s7 = smov [#allocation2]  }
  0x3c   :  { %s485_s12 = sshll.u32 %s679_s7, 4  ;;  %s486_s12 = int_to_ptr.vmem [resolvable:$true] %s485_s12 }
  0x3d   :  { %p658_p1 = scmp.lt.s32.totalorder %s486_s12, %s486_s12 }
  0x3e   :  { %610 = vmatpush3.bf16.msra.mxu0 %v644_v9 }
  0xf4   :  { %v153_v11 = vpop.f32.mrb[0].mxu0 }
  0xf5   :  { %v154_v12 = vadd.f32 %v496_v10, %v153_v11  ;;  %v573_v13 = vpop.f32.mrb[1].mxu0 }
  0xf6   :  { %v156_v14 = vpop.f32.mrb[2].mxu0 }
  0xf7   :  { %v157_v15 = vadd.f32 %v496_v10, %v156_v14  ;;  %162 = vadd.xlane.f32.xlu0 %v154_v12  ;;  %v574_v16 = vpop.f32.mrb[3].mxu0  ;;  %v168_v17 = vmul.f32 %v154_v12, %v154_v12 }
  0xf9   :  { %170 = vadd.xlane.f32.xlu1 %v168_v17  ;;  %v169_v18 = vmul.f32 %v157_v15, %v157_v15 }
  0xfb   :  { %164 = vadd.xlane.f32.xlu0 %v157_v15 }
  0xfd   :  { %172 = vadd.xlane.f32.xlu1 %v169_v18 }
 0x184   :  { %v163_v27 = vpop.xlane.xlu0 %162 }
 0x185   :  { %v166_v28 = vmul.f32 0.03125, %v163_v27 }
 0x186   :  { %v171_v29 = vpop.xlane.xlu1 %170 }
 0x187   :  { %v176_v30 = vmul.f32 %v166_v28, %v166_v28  ;;  %v174_v31 = vmul.f32 0.03125, %v171_v29  ;;  %v180_v41 = vsub.f32 %v154_v12, %v166_v28  ;;  %v518_v29 = vld [vmem:[%s888_s8] ss:$0 sm:$0xff]  ;;  %s653_s8 = scalar_lea.vmem %s486_s12, 256 }
 0x188   :  { %v165_v32 = vpop.xlane.xlu0 %164  ;;  %p654_p0 = scmp.ne.s32.totalorder %s486_s12, %s653_s8  ;;  %p659_p2 = scmp.lt.s32.totalorder %s653_s8, %s653_s8 }
 0x189   :  { %v178_v33 = vsub.f32 %v174_v31, %v176_v30  ;;  %v167_v34 = vmul.f32 0.03125, %v165_v32 }
 0x18a   :  { %v173_v35 = vpop.xlane.xlu1 %172  ;;  %p660_p3 = por %p659_p2, %p658_p1 }
 0x18b   :  { %v182_v36 = vadd.f32 1e-05, %v178_v33  ;;  %v177_v37 = vmul.f32 %v167_v34, %v167_v34  ;;  %v175_v38 = vmul.f32 0.03125, %v173_v35  ;;  %v181_v45 = vsub.f32 %v157_v15, %v167_v34 }
 0x18c   :  { %p661_p4 = pnand %p660_p3, %p654_p0 }
 0x18d   :  { %645 = vrsqrt.f32 %v182_v36  ;;  %v179_v39 = vsub.f32 %v175_v38, %v177_v37  ;;  %v519_v38 = vld [vmem:[%s890_s10] ss:$0 sm:$0xff] }
 0x18f   :  { %v183_v40 = vadd.f32 1e-05, %v179_v39 }
 0x191   :  { %647 = vrsqrt.f32 %v183_v40 }
 0x197   :  { %v646_v42 = vpop.eup %645 }
 0x198   :  { %v186_v44 = vmul.f32 %v646_v42, %v180_v41 }
 0x19a   :  { %v194_v46 = vmul.f32 %v506_v43, %v186_v44 }
 0x19b   :  { %v648_v47 = vpop.eup %647 }
 0x19c   :  { %v187_v49 = vmul.f32 %v648_v47, %v181_v45  ;;  %v202_v51 = vadd.f32 %v507_v48, %v194_v46 }
 0x19e   :  { %v195_v50 = vmul.f32 %v506_v43, %v187_v49  ;;  %v204_v53 = vmax.f32 %v202_v51, 0.0 }
 0x1a0   :  { %v203_v52 = vadd.f32 %v507_v48, %v195_v50 }
 0x1a2   :  { %v205_v54 = vmax.f32 %v203_v52, 0.0 }
 0x1a4   :  { %v206_v55 = vpack.c.bf16 %v205_v54, %v204_v53 }
 0x1a6   :  { %592 = vmatmul.mubr.bf16.vlgmr.msra.gmra.mrb[0].mxu1 %v206_v55 }
 0x279   :  { %v312_v57 = vpop.f32.mrb[0].mxu1 }
 0x27a   :  { %v313_v58 = vadd.f32 %v508_v56, %v312_v57  ;;  %v593_v59 = vpop.f32.mrb[1].mxu1 }
 0x27b   :  { %v315_v60 = vpop.f32.mrb[2].mxu1 }
 0x27c   :  { %v316_v61 = vadd.f32 %v508_v56, %v315_v60  ;;  %321 = vadd.xlane.f32.xlu0 %v313_v58  ;;  %v594_v62 = vpop.f32.mrb[3].mxu1  ;;  %v327_v63 = vmul.f32 %v313_v58, %v313_v58 }
 0x27e   :  { %323 = vadd.xlane.f32.xlu1 %v316_v61  ;;  %v328_v0 = vmul.f32 %v316_v61, %v316_v61 }
 0x280   :  { %329 = vadd.xlane.f32.xlu0 %v327_v63 }
 0x282   :  { %331 = vadd.xlane.f32.xlu1 %v328_v0 }
 0x309   :  { %v322_v10 = vpop.xlane.xlu0 %321 }
 0x30a   :  { %v325_v11 = vmul.f32 0.03125, %v322_v10 }
 0x30b   :  { %v324_v12 = vpop.xlane.xlu1 %323 }
 0x30c   :  { %v326_v13 = vmul.f32 0.03125, %v324_v12  ;;  %v335_v15 = vmul.f32 %v325_v11, %v325_v11  ;;  %v339_v24 = vsub.f32 %v313_v58, %v325_v11 }
 0x30d   :  { %v330_v14 = vpop.xlane.xlu0 %329 }
 0x30e   :  { %v333_v16 = vmul.f32 0.03125, %v330_v14  ;;  %v336_v18 = vmul.f32 %v326_v13, %v326_v13  ;;  %v340_v26 = vsub.f32 %v316_v61, %v326_v13 }
 0x30f   :  { %v332_v17 = vpop.xlane.xlu1 %331 }
 0x310   :  { %v337_v19 = vsub.f32 %v333_v16, %v335_v15  ;;  %v334_v20 = vmul.f32 0.03125, %v332_v17 }
 0x312   :  { %v341_v21 = vadd.f32 1e-05, %v337_v19  ;;  %v338_v22 = vsub.f32 %v334_v20, %v336_v18 }
 0x314   :  { %649 = vrsqrt.f32 %v341_v21  ;;  %v342_v23 = vadd.f32 1e-05, %v338_v22 }
 0x316   :  { %651 = vrsqrt.f32 %v342_v23 }
 0x31e   :  { %v650_v25 = vpop.eup %649 }
 0x31f   :  { %v345_v27 = vmul.f32 %v650_v25, %v339_v24 }
 0x320   :  { %v652_v28 = vpop.eup %651 }
 0x321   :  { %v346_v30 = vmul.f32 %v652_v28, %v340_v26  ;;  %v353_v31 = vmul.f32 %v517_v1, %v345_v27 }
 0x323   :  { %v354_v32 = vmul.f32 %v517_v1, %v346_v30  ;;  %v361_v33 = vadd.f32 %v518_v29, %v353_v31 }
 0x325   :  { %v362_v34 = vadd.f32 %v518_v29, %v354_v32  ;;  %v363_v35 = vmax.f32 %v361_v33, 0.0 }
 0x327   :  { %v364_v36 = vmax.f32 %v362_v34, 0.0 }
 0x329   :  { %v365_v37 = vpack.c.bf16 %v364_v36, %v363_v35 }
 0x32b   :  { %612 = vmatmul.mubr.bf16.vlgmr.msra.gmra.mrb[4].mxu0 %v365_v37 }
 0x3fe   :  { %v471_v39 = vpop.f32.mrb[4].mxu0 }
 0x3ff   :  { %v472_v40 = vadd.f32 %v519_v38, %v471_v39  ;;  %v613_v41 = vpop.f32.mrb[5].mxu0 }
 0x400   :  { %v474_v42 = vpop.f32.mrb[6].mxu0 }
 0x401   :  { %478 = vst [vmem:[#allocation2] sm:$0xff] %v472_v40  ;;  %v475_v43 = vadd.f32 %v519_v38, %v474_v42  ;;  %v614_v44 = vpop.f32.mrb[7].mxu0 }
 0x403   :  { %479 = vst [vmem:[#allocation2 + $0x8] sm:$0xff] %v475_v43 }
 0x404   :  { %664 = shalt.err (!%p661_p4)
}
 0x405   :  { %s665_s14 = scalar_lea.hbm %s891_s11, 256 }
 0x406   :  { %p666_p5 = scmp.ne.s32.totalorder %s891_s11, %s665_s14  ;;  %p669_p6 = scmp.lt.u32.totalorder %s665_s14, %s891_s11 }
 0x408   :  { %p671_p7 = pnand %p669_p6, %p666_p5 }
 0x40a   :  { %674 = shalt.err (!%p671_p7)
}
 0x40b   :  { %s680_s6 = smov 128   ;;  %s681_s17 = smov 8  }
 0x40c   :  { %491 = dma.vmem_to_hbm [thread:$0]  %s486_s12, 256, %s891_s11, [#allocation3], %s680_s6, %s680_s6, %s681_s17  }
 0x40d   :  { %675 = dma.done.wait [#allocation3], 256  }
 0x40e   :  { %676 = vsyncadd [#allocation3], 4294967040 }
 0x40f   :  { %495 = vsyncpa [#allocation3], 1 }

</bundles_post_ra>
